<compile_context>
chip_gen: v6e
topology: v6e:2x2x1
jax: 0.10.0
libtpu: 0.0.40
codegen_flags: <defaults>
</compile_context>

<pallas_src>
import functools
import numpy as np
import jax
import jax.numpy as jnp
from jax.experimental import pallas as pl
from jax.experimental.pallas import tpu as pltpu

EPS = 1e-5


# ----------------------------- Pallas kernel ------------------------------ #
def gm_kernel(x_ref, p_ref, o_ref, *, N, C, H, W):
    NC = N * C
    HW = H * W
    Cg = C // 2
    D = 2 * Cg - 1                       # neighbor-offset count for grouped 1x1
    inv_count = 1.0 / float(N * H * W)

    def depthwise3x3(t, base):
        # Separable roll scheme with pre-masked per-tap planes p_ref[base + kh*3+kw]:
        #   v_up[p]  = t[p - W]  (value at h-1),  v_dn[p] = t[p + W]  (value at h+1)
        #   c_kw     = sum_kh plane[kh,kw] * v_(kh-1)        (boundary zeros baked in)
        #   out      = c_1 + roll(c_0, +1) + roll(c_2, -1)
        v_up = pltpu.roll(t, W, axis=1)
        v_dn = pltpu.roll(t, HW - W, axis=1)
        c_l = p_ref[base + 0] * v_up + p_ref[base + 3] * t + p_ref[base + 6] * v_dn
        c_c = p_ref[base + 1] * v_up + p_ref[base + 4] * t + p_ref[base + 7] * v_dn
        c_r = p_ref[base + 2] * v_up + p_ref[base + 5] * t + p_ref[base + 8] * v_dn
        return c_c + pltpu.roll(c_l, 1, axis=1) + pltpu.roll(c_r, HW - 1, axis=1)

    def grouped_pw1x1(t, coefs):
        # groups=2, Cin == Cout: output row r mixes rows r+d, d in (-(Cg-1), Cg-1),
        # coefficients precomputed per row (zero where d leaves the group / image).
        acc = t * coefs[:, Cg - 1:Cg]                       # d = 0
        for d in range(1, Cg):
            acc = acc + pltpu.roll(t, (NC - d) % NC, axis=0) * coefs[:, Cg - 1 + d:Cg + d]
            acc = acc + pltpu.roll(t, d, axis=0) * coefs[:, Cg - 1 - d:Cg - d]
        return acc

    def bn_relu(t, g_col, b_col):
        # training-mode BatchNorm, one fused statistics pass (fp32):
        # E[x] and E[x^2] accumulated together; batch fold = doubling tree of
        # sublane rolls (wraps within NC so every row sees its channel's total).
        s1 = t
        s2 = t * t
        if (N & (N - 1)) == 0:
            k = 1
            while k < N:
                s1 = s1 + pltpu.roll(s1, k * C, axis=0)
                s2 = s2 + pltpu.roll(s2, k * C, axis=0)
                k *= 2
        else:
            tt = s2
            for k in range(1, N):
                s1 = s1 + pltpu.roll(t, k * C, axis=0)
                s2 = s2 + pltpu.roll(tt, k * C, axis=0)
        mean = jnp.sum(s1, axis=1, keepdims=True) * inv_count
        var = jnp.sum(s2, axis=1, keepdims=True) * inv_count - mean * mean
        scale = g_col * jax.lax.rsqrt(var + EPS)
        return jnp.maximum((t - mean) * scale + b_col, 0.0)

    # per-row parameter block (last plane): pw1 coefs | g1 | b1 | pw2 coefs | g2 | b2
    rp = p_ref[18]
    pw1 = rp[:, 0:D]
    g1 = rp[:, D:D + 1]
    b1 = rp[:, D + 1:D + 2]
    pw2 = rp[:, D + 2:2 * D + 2]
    g2 = rp[:, 2 * D + 2:2 * D + 3]
    b2 = rp[:, 2 * D + 3:2 * D + 4]

    # ---- block 1
    h = bn_relu(grouped_pw1x1(depthwise3x3(x_ref[...], 0), pw1), g1, b1)
    # ---- block 2
    h = bn_relu(grouped_pw1x1(depthwise3x3(h, 9), pw2), g2, b2)
    # ---- residual (re-read x from VMEM instead of keeping it live)
    o_ref[...] = h + x_ref[...]


# ------------------------------ glue helpers ------------------------------ #
def _dw_planes(w, N, C, H, W):
    """(C,1,3,3) depthwise weight -> (9, N*C, H*W) pre-masked per-tap planes.

    Plane k = kh*3+kw carries w[c, kh, kw] at every pixel, zeroed wherever the
    separable roll scheme would otherwise pull a value across the zero-pad
    boundary (vertical mask at the un-rolled position, horizontal mask at the
    pre-roll position)."""
    w = np.asarray(w, dtype=np.float32).reshape(C, 3, 3)
    NC, HW = N * C, H * W
    h_idx = np.arange(HW) // W
    w_idx = np.arange(HW) % W
    planes = np.zeros((9, NC, HW), dtype=np.float32)
    for kh in range(3):
        dh = kh - 1
        if dh < 0:
            vmask = h_idx >= 1
        elif dh > 0:
            vmask = h_idx <= H - 2
        else:
            vmask = np.ones(HW, dtype=bool)
        for kw in range(3):
            dwo = kw - 1
            if dwo > 0:
                hmask = w_idx != 0
            elif dwo < 0:
                hmask = w_idx != W - 1
            else:
                hmask = np.ones(HW, dtype=bool)
            tap = np.tile(w[:, kh, kw], N)                    # (NC,)
            planes[kh * 3 + kw] = tap[:, None] * (vmask & hmask).astype(np.float32)[None, :]
    return planes


def _pw_row_coefs(w, N):
    """(C, C//2, 1, 1) grouped (groups=2) 1x1 weight -> (N*C, 2*Cg-1) neighbor coefs.

    coef[r, Cg-1+d] multiplies row r+d; zero whenever r+d leaves the group/image.
    Requires Cin == Cout (needed anyway for the residual add)."""
    w = np.asarray(w, dtype=np.float32)
    C, Cg = w.shape[0], w.shape[1]
    assert C == 2 * Cg, "grouped 1x1 with groups=2 requires Cin == Cout"
    D = 2 * Cg - 1
    coefs = np.zeros((C, D), dtype=np.float32)
    for co in range(C):
        co_l = co % Cg
        for ci_l in range(Cg):
            d = ci_l - co_l
            coefs[co, Cg - 1 + d] = w[co, ci_l, 0, 0]
    return np.tile(coefs, (N, 1))


def _pack_params(p, N, C, H, W):
    """All GM parameters -> one (19, N*C, H*W) f32 array (single pallas_call input)."""
    NC, HW = N * C, H * W
    Cg = C // 2
    D = 2 * Cg - 1
    assert 2 * D + 4 <= HW, "row-parameter block does not fit in the lane dimension"
    rp = np.zeros((NC, HW), dtype=np.float32)
    rp[:, 0:D] = _pw_row_coefs(p['pw1'], N)
    rp[:, D] = np.tile(np.asarray(p['g1'], np.float32), N)
    rp[:, D + 1] = np.tile(np.asarray(p['b1'], np.float32), N)
    rp[:, D + 2:2 * D + 2] = _pw_row_coefs(p['pw2'], N)
    rp[:, 2 * D + 2] = np.tile(np.asarray(p['g2'], np.float32), N)
    rp[:, 2 * D + 3] = np.tile(np.asarray(p['b2'], np.float32), N)
    packed = np.concatenate([_dw_planes(p['dw1'], N, C, H, W),
                             _dw_planes(p['dw2'], N, C, H, W),
                             rp[None]], axis=0)
    return jnp.asarray(packed)


@functools.partial(jax.jit, static_argnames=("N", "C", "H", "W"))
def _call_kernel(x2d, params, *, N, C, H, W):
    kern = functools.partial(gm_kernel, N=N, C=C, H=H, W=W)
    return pl.pallas_call(
        kern,
        out_shape=jax.ShapeDtypeStruct((N * C, H * W), jnp.float32),
        in_specs=[pl.BlockSpec(memory_space=pltpu.MemorySpace.VMEM),
                  pl.BlockSpec(memory_space=pltpu.MemorySpace.VMEM)],
        out_specs=pl.BlockSpec(memory_space=pltpu.MemorySpace.VMEM),
        input_output_aliases={0: 0},          # output reuses x2d's buffer
    )(x2d, params)


def gm_forward(x_nchw, p):
    """Public entry point: NCHW in, NCHW out (matches PyTorch GM.forward)."""
    N, C, H, W = x_nchw.shape
    assert p['pw2'].shape[0] == C, "residual add requires out_channels == in_channels"
    assert C % 2 == 0, "groups=2 requires an even channel count"
    x2d = x_nchw.astype(jnp.float32).reshape(N * C, H * W)        # contiguous reshape
    params = _pack_params(p, N, C, H, W)
    out2d = _call_kernel(x2d, params, N=N, C=C, H=H, W=W)
    return out2d.reshape(N, C, H, W)


# --------------------------- pure-JAX reference ---------------------------- #
def gm_reference(x, p):
    hi = jax.lax.Precision.HIGHEST

    def dw(x, w):
        return jax.lax.conv_general_dilated(
            x, w, window_strides=(1, 1), padding=((1, 1), (1, 1)),
            dimension_numbers=('NCHW', 'OIHW', 'NCHW'),
            feature_group_count=x.shape[1], precision=hi)

    def pw(x, w, groups):
        return jax.lax.conv_general_dilated(
            x, w, window_strides=(1, 1), padding=((0, 0), (0, 0)),
            dimension_numbers=('NCHW', 'OIHW', 'NCHW'),
            feature_group_count=groups, precision=hi)

    def bn_relu(x, g, b):
        mean = jnp.mean(x, axis=(0, 2, 3), keepdims=True)
        var = jnp.mean((x - mean) ** 2, axis=(0, 2, 3), keepdims=True)
        y = (x - mean) / jnp.sqrt(var + EPS)
        y = y * g[None, :, None, None] + b[None, :, None, None]
        return jnp.maximum(y, 0.0)

    h = bn_relu(pw(dw(x, p['dw1']), p['pw1'], 2), p['g1'], p['b1'])
    h = bn_relu(pw(dw(h, p['dw2']), p['pw2'], 2), p['g2'], p['b2'])
    return h + x


# ---------------------------------- main ----------------------------------- #
if __name__ == "__main__":
    key = jax.random.PRNGKey(0)
    in_channels = out_channels = 4          # residual add requires Cin == Cout
    N, H, W = 2, 16, 16

    ks = jax.random.split(key, 9)
    params = {
        'dw1': 0.2 * jax.random.normal(ks[0], (in_channels, 1, 3, 3), jnp.float32),
        'pw1': 0.2 * jax.random.normal(ks[1], (in_channels, in_channels // 2, 1, 1), jnp.float32),
        'g1': 1.0 + 0.1 * jax.random.normal(ks[2], (in_channels,), jnp.float32),
        'b1': 0.1 * jax.random.normal(ks[3], (in_channels,), jnp.float32),
        'dw2': 0.2 * jax.random.normal(ks[4], (in_channels, 1, 3, 3), jnp.float32),
        'pw2': 0.2 * jax.random.normal(ks[5], (out_channels, in_channels // 2, 1, 1), jnp.float32),
        'g2': 1.0 + 0.1 * jax.random.normal(ks[6], (out_channels,), jnp.float32),
        'b2': 0.1 * jax.random.normal(ks[7], (out_channels,), jnp.float32),
    }
    x = jax.random.normal(ks[8], (N, in_channels, H, W), jnp.float32)

    out = gm_forward(x, params)
    out = jax.block_until_ready(out)

    ref = gm_reference(x, params)
    np.testing.assert_allclose(np.asarray(out), np.asarray(ref), atol=1e-3, rtol=1e-3)

    print("KERNEL_OK")
</pallas_src>

<mosaic_0001>
module attributes {stable_mosaic.version = 11 : i64} {
  func.func @gm_kernel(%arg0: memref<8x256xf32, #tpu.memory_space<vmem>>, %arg1: memref<19x8x256xf32, #tpu.memory_space<vmem>>, %arg2: memref<8x256xf32, #tpu.memory_space<vmem>>) attributes {dimension_semantics = [], scalar_prefetch = 0 : i64, scratch_operands = 0 : i64, tpu.core_type = #tpu.core_type<tc>} {
    %c18 = arith.constant 18 : index
    %c0 = arith.constant 0 : index
    %c0_0 = arith.constant 0 : index
    %0 = vector.load %arg1[%c18, %c0, %c0_0] : memref<19x8x256xf32, #tpu.memory_space<vmem>>, vector<1x8x256xf32>
    %1 = vector.shape_cast %0 : vector<1x8x256xf32> to vector<8x256xf32>
    %2 = vector.extract_strided_slice %1 {offsets = [0, 0], sizes = [8, 3], strides = [1, 1]} : vector<8x256xf32> to vector<8x3xf32>
    %3 = vector.extract_strided_slice %1 {offsets = [0, 3], sizes = [8, 1], strides = [1, 1]} : vector<8x256xf32> to vector<8x1xf32>
    %4 = vector.extract_strided_slice %1 {offsets = [0, 4], sizes = [8, 1], strides = [1, 1]} : vector<8x256xf32> to vector<8x1xf32>
    %5 = vector.extract_strided_slice %1 {offsets = [0, 5], sizes = [8, 3], strides = [1, 1]} : vector<8x256xf32> to vector<8x3xf32>
    %6 = vector.extract_strided_slice %1 {offsets = [0, 8], sizes = [8, 1], strides = [1, 1]} : vector<8x256xf32> to vector<8x1xf32>
    %7 = vector.extract_strided_slice %1 {offsets = [0, 9], sizes = [8, 1], strides = [1, 1]} : vector<8x256xf32> to vector<8x1xf32>
    %c0_1 = arith.constant 0 : index
    %c0_2 = arith.constant 0 : index
    %8 = vector.load %arg0[%c0_1, %c0_2] : memref<8x256xf32, #tpu.memory_space<vmem>>, vector<8x256xf32>
    %c16_i32 = arith.constant 16 : i32
    %9 = tpu.dynamic_rotate %8 by %c16_i32 dim 1 : vector<8x256xf32>, i32 -> vector<8x256xf32>
    %c240_i32 = arith.constant 240 : i32
    %10 = tpu.dynamic_rotate %8 by %c240_i32 dim 1 : vector<8x256xf32>, i32 -> vector<8x256xf32>
    %c0_3 = arith.constant 0 : index
    %c0_4 = arith.constant 0 : index
    %c0_5 = arith.constant 0 : index
    %11 = vector.load %arg1[%c0_3, %c0_4, %c0_5] : memref<19x8x256xf32, #tpu.memory_space<vmem>>, vector<1x8x256xf32>
    %12 = vector.shape_cast %11 : vector<1x8x256xf32> to vector<8x256xf32>
    %13 = arith.mulf %12, %9 : vector<8x256xf32>
    %c3 = arith.constant 3 : index
    %c0_6 = arith.constant 0 : index
    %c0_7 = arith.constant 0 : index
    %14 = vector.load %arg1[%c3, %c0_6, %c0_7] : memref<19x8x256xf32, #tpu.memory_space<vmem>>, vector<1x8x256xf32>
    %15 = vector.shape_cast %14 : vector<1x8x256xf32> to vector<8x256xf32>
    %16 = arith.mulf %15, %8 : vector<8x256xf32>
    %17 = arith.addf %13, %16 : vector<8x256xf32>
    %c6 = arith.constant 6 : index
    %c0_8 = arith.constant 0 : index
    %c0_9 = arith.constant 0 : index
    %18 = vector.load %arg1[%c6, %c0_8, %c0_9] : memref<19x8x256xf32, #tpu.memory_space<vmem>>, vector<1x8x256xf32>
    %19 = vector.shape_cast %18 : vector<1x8x256xf32> to vector<8x256xf32>
    %20 = arith.mulf %19, %10 : vector<8x256xf32>
    %21 = arith.addf %17, %20 : vector<8x256xf32>
    %c1 = arith.constant 1 : index
    %c0_10 = arith.constant 0 : index
    %c0_11 = arith.constant 0 : index
    %22 = vector.load %arg1[%c1, %c0_10, %c0_11] : memref<19x8x256xf32, #tpu.memory_space<vmem>>, vector<1x8x256xf32>
    %23 = vector.shape_cast %22 : vector<1x8x256xf32> to vector<8x256xf32>
    %24 = arith.mulf %23, %9 : vector<8x256xf32>
    %c4 = arith.constant 4 : index
    %c0_12 = arith.constant 0 : index
    %c0_13 = arith.constant 0 : index
    %25 = vector.load %arg1[%c4, %c0_12, %c0_13] : memref<19x8x256xf32, #tpu.memory_space<vmem>>, vector<1x8x256xf32>
    %26 = vector.shape_cast %25 : vector<1x8x256xf32> to vector<8x256xf32>
    %27 = arith.mulf %26, %8 : vector<8x256xf32>
    %28 = arith.addf %24, %27 : vector<8x256xf32>
    %c7 = arith.constant 7 : index
    %c0_14 = arith.constant 0 : index
    %c0_15 = arith.constant 0 : index
    %29 = vector.load %arg1[%c7, %c0_14, %c0_15] : memref<19x8x256xf32, #tpu.memory_space<vmem>>, vector<1x8x256xf32>
    %30 = vector.shape_cast %29 : vector<1x8x256xf32> to vector<8x256xf32>
    %31 = arith.mulf %30, %10 : vector<8x256xf32>
    %32 = arith.addf %28, %31 : vector<8x256xf32>
    %c2 = arith.constant 2 : index
    %c0_16 = arith.constant 0 : index
    %c0_17 = arith.constant 0 : index
    %33 = vector.load %arg1[%c2, %c0_16, %c0_17] : memref<19x8x256xf32, #tpu.memory_space<vmem>>, vector<1x8x256xf32>
    %34 = vector.shape_cast %33 : vector<1x8x256xf32> to vector<8x256xf32>
    %35 = arith.mulf %34, %9 : vector<8x256xf32>
    %c5 = arith.constant 5 : index
    %c0_18 = arith.constant 0 : index
    %c0_19 = arith.constant 0 : index
    %36 = vector.load %arg1[%c5, %c0_18, %c0_19] : memref<19x8x256xf32, #tpu.memory_space<vmem>>, vector<1x8x256xf32>
    %37 = vector.shape_cast %36 : vector<1x8x256xf32> to vector<8x256xf32>
    %38 = arith.mulf %37, %8 : vector<8x256xf32>
    %39 = arith.addf %35, %38 : vector<8x256xf32>
    %c8 = arith.constant 8 : index
    %c0_20 = arith.constant 0 : index
    %c0_21 = arith.constant 0 : index
    %40 = vector.load %arg1[%c8, %c0_20, %c0_21] : memref<19x8x256xf32, #tpu.memory_space<vmem>>, vector<1x8x256xf32>
    %41 = vector.shape_cast %40 : vector<1x8x256xf32> to vector<8x256xf32>
    %42 = arith.mulf %41, %10 : vector<8x256xf32>
    %43 = arith.addf %39, %42 : vector<8x256xf32>
    %c1_i32 = arith.constant 1 : i32
    %44 = tpu.dynamic_rotate %21 by %c1_i32 dim 1 : vector<8x256xf32>, i32 -> vector<8x256xf32>
    %45 = arith.addf %32, %44 : vector<8x256xf32>
    %c255_i32 = arith.constant 255 : i32
    %46 = tpu.dynamic_rotate %43 by %c255_i32 dim 1 : vector<8x256xf32>, i32 -> vector<8x256xf32>
    %47 = arith.addf %45, %46 : vector<8x256xf32>
    %48 = vector.extract_strided_slice %2 {offsets = [0, 1], sizes = [8, 1], strides = [1, 1]} : vector<8x3xf32> to vector<8x1xf32>
    %49 = vector.broadcast %48 : vector<8x1xf32> to vector<8x256xf32>
    %50 = arith.mulf %47, %49 : vector<8x256xf32>
    %c7_i32 = arith.constant 7 : i32
    %51 = tpu.dynamic_rotate %47 by %c7_i32 dim 0 : vector<8x256xf32>, i32 -> vector<8x256xf32>
    %52 = vector.extract_strided_slice %2 {offsets = [0, 2], sizes = [8, 1], strides = [1, 1]} : vector<8x3xf32> to vector<8x1xf32>
    %53 = vector.broadcast %52 : vector<8x1xf32> to vector<8x256xf32>
    %54 = arith.mulf %51, %53 : vector<8x256xf32>
    %55 = arith.addf %50, %54 : vector<8x256xf32>
    %c1_i32_22 = arith.constant 1 : i32
    %56 = tpu.dynamic_rotate %47 by %c1_i32_22 dim 0 : vector<8x256xf32>, i32 -> vector<8x256xf32>
    %57 = vector.extract_strided_slice %2 {offsets = [0, 0], sizes = [8, 1], strides = [1, 1]} : vector<8x3xf32> to vector<8x1xf32>
    %58 = vector.broadcast %57 : vector<8x1xf32> to vector<8x256xf32>
    %59 = arith.mulf %56, %58 : vector<8x256xf32>
    %60 = arith.addf %55, %59 : vector<8x256xf32>
    %61 = arith.mulf %60, %60 : vector<8x256xf32>
    %c4_i32 = arith.constant 4 : i32
    %62 = tpu.dynamic_rotate %60 by %c4_i32 dim 0 : vector<8x256xf32>, i32 -> vector<8x256xf32>
    %63 = arith.addf %60, %62 : vector<8x256xf32>
    %c4_i32_23 = arith.constant 4 : i32
    %64 = tpu.dynamic_rotate %61 by %c4_i32_23 dim 0 : vector<8x256xf32>, i32 -> vector<8x256xf32>
    %65 = arith.addf %61, %64 : vector<8x256xf32>
    %cst = arith.constant dense<0.000000e+00> : vector<8xf32>
    %66 = vector.multi_reduction <add>, %63, %cst [1] : vector<8x256xf32> to vector<8xf32>
    %67 = vector.shape_cast %66 : vector<8xf32> to vector<8x1xf32>
    %cst_24 = arith.constant 0.001953125 : f32
    %68 = vector.broadcast %cst_24 : f32 to vector<8x1xf32>
    %69 = arith.mulf %67, %68 : vector<8x1xf32>
    %cst_25 = arith.constant dense<0.000000e+00> : vector<8xf32>
    %70 = vector.multi_reduction <add>, %65, %cst_25 [1] : vector<8x256xf32> to vector<8xf32>
    %71 = vector.shape_cast %70 : vector<8xf32> to vector<8x1xf32>
    %cst_26 = arith.constant 0.001953125 : f32
    %72 = vector.broadcast %cst_26 : f32 to vector<8x1xf32>
    %73 = arith.mulf %71, %72 : vector<8x1xf32>
    %74 = arith.mulf %69, %69 : vector<8x1xf32>
    %75 = arith.subf %73, %74 : vector<8x1xf32>
    %cst_27 = arith.constant 9.99999974E-6 : f32
    %76 = vector.broadcast %cst_27 : f32 to vector<8x1xf32>
    %77 = arith.addf %75, %76 : vector<8x1xf32>
    %78 = math.rsqrt %77 : vector<8x1xf32>
    %79 = arith.mulf %3, %78 : vector<8x1xf32>
    %80 = vector.broadcast %69 : vector<8x1xf32> to vector<8x256xf32>
    %81 = arith.subf %60, %80 : vector<8x256xf32>
    %82 = vector.broadcast %79 : vector<8x1xf32> to vector<8x256xf32>
    %83 = arith.mulf %81, %82 : vector<8x256xf32>
    %84 = vector.broadcast %4 : vector<8x1xf32> to vector<8x256xf32>
    %85 = arith.addf %83, %84 : vector<8x256xf32>
    %cst_28 = arith.constant 0.000000e+00 : f32
    %86 = vector.broadcast %cst_28 : f32 to vector<8x256xf32>
    %87 = arith.maximumf %85, %86 : vector<8x256xf32>
    %c16_i32_29 = arith.constant 16 : i32
    %88 = tpu.dynamic_rotate %87 by %c16_i32_29 dim 1 : vector<8x256xf32>, i32 -> vector<8x256xf32>
    %c240_i32_30 = arith.constant 240 : i32
    %89 = tpu.dynamic_rotate %87 by %c240_i32_30 dim 1 : vector<8x256xf32>, i32 -> vector<8x256xf32>
    %c9 = arith.constant 9 : index
    %c0_31 = arith.constant 0 : index
    %c0_32 = arith.constant 0 : index
    %90 = vector.load %arg1[%c9, %c0_31, %c0_32] : memref<19x8x256xf32, #tpu.memory_space<vmem>>, vector<1x8x256xf32>
    %91 = vector.shape_cast %90 : vector<1x8x256xf32> to vector<8x256xf32>
    %92 = arith.mulf %91, %88 : vector<8x256xf32>
    %c12 = arith.constant 12 : index
    %c0_33 = arith.constant 0 : index
    %c0_34 = arith.constant 0 : index
    %93 = vector.load %arg1[%c12, %c0_33, %c0_34] : memref<19x8x256xf32, #tpu.memory_space<vmem>>, vector<1x8x256xf32>
    %94 = vector.shape_cast %93 : vector<1x8x256xf32> to vector<8x256xf32>
    %95 = arith.mulf %94, %87 : vector<8x256xf32>
    %96 = arith.addf %92, %95 : vector<8x256xf32>
    %c15 = arith.constant 15 : index
    %c0_35 = arith.constant 0 : index
    %c0_36 = arith.constant 0 : index
    %97 = vector.load %arg1[%c15, %c0_35, %c0_36] : memref<19x8x256xf32, #tpu.memory_space<vmem>>, vector<1x8x256xf32>
    %98 = vector.shape_cast %97 : vector<1x8x256xf32> to vector<8x256xf32>
    %99 = arith.mulf %98, %89 : vector<8x256xf32>
    %100 = arith.addf %96, %99 : vector<8x256xf32>
    %c10 = arith.constant 10 : index
    %c0_37 = arith.constant 0 : index
    %c0_38 = arith.constant 0 : index
    %101 = vector.load %arg1[%c10, %c0_37, %c0_38] : memref<19x8x256xf32, #tpu.memory_space<vmem>>, vector<1x8x256xf32>
    %102 = vector.shape_cast %101 : vector<1x8x256xf32> to vector<8x256xf32>
    %103 = arith.mulf %102, %88 : vector<8x256xf32>
    %c13 = arith.constant 13 : index
    %c0_39 = arith.constant 0 : index
    %c0_40 = arith.constant 0 : index
    %104 = vector.load %arg1[%c13, %c0_39, %c0_40] : memref<19x8x256xf32, #tpu.memory_space<vmem>>, vector<1x8x256xf32>
    %105 = vector.shape_cast %104 : vector<1x8x256xf32> to vector<8x256xf32>
    %106 = arith.mulf %105, %87 : vector<8x256xf32>
    %107 = arith.addf %103, %106 : vector<8x256xf32>
    %c16 = arith.constant 16 : index
    %c0_41 = arith.constant 0 : index
    %c0_42 = arith.constant 0 : index
    %108 = vector.load %arg1[%c16, %c0_41, %c0_42] : memref<19x8x256xf32, #tpu.memory_space<vmem>>, vector<1x8x256xf32>
    %109 = vector.shape_cast %108 : vector<1x8x256xf32> to vector<8x256xf32>
    %110 = arith.mulf %109, %89 : vector<8x256xf32>
    %111 = arith.addf %107, %110 : vector<8x256xf32>
    %c11 = arith.constant 11 : index
    %c0_43 = arith.constant 0 : index
    %c0_44 = arith.constant 0 : index
    %112 = vector.load %arg1[%c11, %c0_43, %c0_44] : memref<19x8x256xf32, #tpu.memory_space<vmem>>, vector<1x8x256xf32>
    %113 = vector.shape_cast %112 : vector<1x8x256xf32> to vector<8x256xf32>
    %114 = arith.mulf %113, %88 : vector<8x256xf32>
    %c14 = arith.constant 14 : index
    %c0_45 = arith.constant 0 : index
    %c0_46 = arith.constant 0 : index
    %115 = vector.load %arg1[%c14, %c0_45, %c0_46] : memref<19x8x256xf32, #tpu.memory_space<vmem>>, vector<1x8x256xf32>
    %116 = vector.shape_cast %115 : vector<1x8x256xf32> to vector<8x256xf32>
    %117 = arith.mulf %116, %87 : vector<8x256xf32>
    %118 = arith.addf %114, %117 : vector<8x256xf32>
    %c17 = arith.constant 17 : index
    %c0_47 = arith.constant 0 : index
    %c0_48 = arith.constant 0 : index
    %119 = vector.load %arg1[%c17, %c0_47, %c0_48] : memref<19x8x256xf32, #tpu.memory_space<vmem>>, vector<1x8x256xf32>
    %120 = vector.shape_cast %119 : vector<1x8x256xf32> to vector<8x256xf32>
    %121 = arith.mulf %120, %89 : vector<8x256xf32>
    %122 = arith.addf %118, %121 : vector<8x256xf32>
    %c1_i32_49 = arith.constant 1 : i32
    %123 = tpu.dynamic_rotate %100 by %c1_i32_49 dim 1 : vector<8x256xf32>, i32 -> vector<8x256xf32>
    %124 = arith.addf %111, %123 : vector<8x256xf32>
    %c255_i32_50 = arith.constant 255 : i32
    %125 = tpu.dynamic_rotate %122 by %c255_i32_50 dim 1 : vector<8x256xf32>, i32 -> vector<8x256xf32>
    %126 = arith.addf %124, %125 : vector<8x256xf32>
    %127 = vector.extract_strided_slice %5 {offsets = [0, 1], sizes = [8, 1], strides = [1, 1]} : vector<8x3xf32> to vector<8x1xf32>
    %128 = vector.broadcast %127 : vector<8x1xf32> to vector<8x256xf32>
    %129 = arith.mulf %126, %128 : vector<8x256xf32>
    %c7_i32_51 = arith.constant 7 : i32
    %130 = tpu.dynamic_rotate %126 by %c7_i32_51 dim 0 : vector<8x256xf32>, i32 -> vector<8x256xf32>
    %131 = vector.extract_strided_slice %5 {offsets = [0, 2], sizes = [8, 1], strides = [1, 1]} : vector<8x3xf32> to vector<8x1xf32>
    %132 = vector.broadcast %131 : vector<8x1xf32> to vector<8x256xf32>
    %133 = arith.mulf %130, %132 : vector<8x256xf32>
    %134 = arith.addf %129, %133 : vector<8x256xf32>
    %c1_i32_52 = arith.constant 1 : i32
    %135 = tpu.dynamic_rotate %126 by %c1_i32_52 dim 0 : vector<8x256xf32>, i32 -> vector<8x256xf32>
    %136 = vector.extract_strided_slice %5 {offsets = [0, 0], sizes = [8, 1], strides = [1, 1]} : vector<8x3xf32> to vector<8x1xf32>
    %137 = vector.broadcast %136 : vector<8x1xf32> to vector<8x256xf32>
    %138 = arith.mulf %135, %137 : vector<8x256xf32>
    %139 = arith.addf %134, %138 : vector<8x256xf32>
    %140 = arith.mulf %139, %139 : vector<8x256xf32>
    %c4_i32_53 = arith.constant 4 : i32
    %141 = tpu.dynamic_rotate %139 by %c4_i32_53 dim 0 : vector<8x256xf32>, i32 -> vector<8x256xf32>
    %142 = arith.addf %139, %141 : vector<8x256xf32>
    %c4_i32_54 = arith.constant 4 : i32
    %143 = tpu.dynamic_rotate %140 by %c4_i32_54 dim 0 : vector<8x256xf32>, i32 -> vector<8x256xf32>
    %144 = arith.addf %140, %143 : vector<8x256xf32>
    %cst_55 = arith.constant dense<0.000000e+00> : vector<8xf32>
    %145 = vector.multi_reduction <add>, %142, %cst_55 [1] : vector<8x256xf32> to vector<8xf32>
    %146 = vector.shape_cast %145 : vector<8xf32> to vector<8x1xf32>
    %cst_56 = arith.constant 0.001953125 : f32
    %147 = vector.broadcast %cst_56 : f32 to vector<8x1xf32>
    %148 = arith.mulf %146, %147 : vector<8x1xf32>
    %cst_57 = arith.constant dense<0.000000e+00> : vector<8xf32>
    %149 = vector.multi_reduction <add>, %144, %cst_57 [1] : vector<8x256xf32> to vector<8xf32>
    %150 = vector.shape_cast %149 : vector<8xf32> to vector<8x1xf32>
    %cst_58 = arith.constant 0.001953125 : f32
    %151 = vector.broadcast %cst_58 : f32 to vector<8x1xf32>
    %152 = arith.mulf %150, %151 : vector<8x1xf32>
    %153 = arith.mulf %148, %148 : vector<8x1xf32>
    %154 = arith.subf %152, %153 : vector<8x1xf32>
    %cst_59 = arith.constant 9.99999974E-6 : f32
    %155 = vector.broadcast %cst_59 : f32 to vector<8x1xf32>
    %156 = arith.addf %154, %155 : vector<8x1xf32>
    %157 = math.rsqrt %156 : vector<8x1xf32>
    %158 = arith.mulf %6, %157 : vector<8x1xf32>
    %159 = vector.broadcast %148 : vector<8x1xf32> to vector<8x256xf32>
    %160 = arith.subf %139, %159 : vector<8x256xf32>
    %161 = vector.broadcast %158 : vector<8x1xf32> to vector<8x256xf32>
    %162 = arith.mulf %160, %161 : vector<8x256xf32>
    %163 = vector.broadcast %7 : vector<8x1xf32> to vector<8x256xf32>
    %164 = arith.addf %162, %163 : vector<8x256xf32>
    %cst_60 = arith.constant 0.000000e+00 : f32
    %165 = vector.broadcast %cst_60 : f32 to vector<8x256xf32>
    %166 = arith.maximumf %164, %165 : vector<8x256xf32>
    %c0_61 = arith.constant 0 : index
    %c0_62 = arith.constant 0 : index
    %167 = vector.load %arg0[%c0_61, %c0_62] : memref<8x256xf32, #tpu.memory_space<vmem>>, vector<8x256xf32>
    %168 = arith.addf %166, %167 : vector<8x256xf32>
    %c0_63 = arith.constant 0 : index
    %c0_64 = arith.constant 0 : index
    %169 = vector.load %arg2[%c0_63, %c0_64] : memref<8x256xf32, #tpu.memory_space<vmem>>, vector<8x256xf32>
    tpu.vector_store %arg2[%c0_63, %c0_64], %168 {strides = array<i32>} : memref<8x256xf32, #tpu.memory_space<vmem>>, vector<8x256xf32>,
    return
  }
}

</mosaic_0001>

<bundles_post_ra>
// kernel: _call_kernel.1
= control target key start
LH: loop header
LB: loop body
LE: loop exit
PB: predicated region body
PF: predicated region fallthrough
CT: control target
= control target key end

     0   :  { %7 = vsyncpa [#allocation3], 0  ;;  %s601_s0 = inlined_call_operand.hbm [shape: f32[8,256], index: 0, kind: input, shape index: {}, may-alias: {0,2}]   ;;  %s602_s1 = inlined_call_operand.hbm [shape: f32[19,8,256], index: 1, kind: input, shape index: {}]   ;;  %s603_s2 = inlined_call_operand.hbm [shape: f32[8,256], index: 2, kind: output, shape index: {}, may-alias: {0,2}]  }
   0x1   :  { %8 = vsyncpa [#allocation6], 0 }
   0x2   :  { %9 = vsyncpa [#allocation4], 0  ;;  %s469_s9 = smov [#allocation2]   ;;  %s470_s11 = smov [#allocation5]  }
   0x3   :  { %s16_s10 = sshll.u32 %s469_s9, 4  ;;  %s25_s12 = sshll.u32 %s470_s11, 4  ;;  %s17_s10 = int_to_ptr.vmem [resolvable:$true] %s16_s10  ;;  %s26_s12 = int_to_ptr.vmem [resolvable:$true] %s25_s12 }
   0x4   :  { %s411_s13 = scalar_lea.vmem %s17_s10, 256  ;;  %p416_p1 = scmp.lt.s32.totalorder %s17_s10, %s17_s10 }
   0x5   :  { %p412_p0 = scmp.ne.s32.totalorder %s17_s10, %s411_s13  ;;  %p417_p2 = scmp.lt.s32.totalorder %s411_s13, %s411_s13 }
   0x7   :  { %p418_p3 = por %p417_p2, %p416_p1 }
   0x9   :  { %p419_p4 = pnand %p418_p3, %p412_p0 }
   0xb   :  { %422 = shalt.err (!%p419_p4)
}
   0xc   :  { %19 = dma.hbm_to_vmem [thread:$0]  %s601_s0, 256, %s17_s10, [#allocation3]  }
   0xd   :  { %s431_s16 = scalar_lea.vmem %s26_s12, 4864  ;;  %p436_p6 = scmp.lt.s32.totalorder %s26_s12, %s26_s12 }
   0xe   :  { %p432_p5 = scmp.ne.s32.totalorder %s26_s12, %s431_s16  ;;  %p437_p7 = scmp.lt.s32.totalorder %s431_s16, %s431_s16 }
  0x10   :  { %p438_p8 = por %p437_p7, %p436_p6 }
  0x12   :  { %p439_p9 = pnand %p438_p8, %p432_p5 }
  0x14   :  { %442 = shalt.err (!%p439_p9)
}
  0x15   :  { %s471_s17 = smov 256   ;;  %s472_s18 = smov 16  }
  0x16   :  { %31 = dma.hbm_to_vmem [thread:$0]  %s602_s1, 4864, %s26_s12, [#allocation6], %s471_s17, %s471_s17, %s472_s18  }
  0x17   :  { %463 = dma.done.wait [#allocation3], 256  }
  0x18   :  { %464 = vsyncadd [#allocation3], 4294967040 }
  0x19   :  { %465 = dma.done.wait [#allocation6], 4864  }
  0x1a   :  { %466 = vsyncadd [#allocation6], 4294962432  ;;  %v509_v0 = vld [vmem:[#allocation2] sm:$0xff]  ;;  %s473_s0 = smov 112   ;;  %v515_v1 = vld [vmem:[#allocation2 + $0x8] sm:$0xff]  ;;  %v474_v2 = vmov 2   ;;  %v46_v4 = vlaneseq }
  0x1b   :  { %51 = vrot.lane.b32.xlu1 %v509_v0, %s473_s0  ;;  %42 = vrot.lane.b32.xlu0 %v509_v0, %s472_s18  ;;  %v475_v3 = vmov 1   ;;  %v64_v8 = vld [vmem:[#allocation5 + $0x38] sm:$0xff]  ;;  %v63_v9 = vld [vmem:[#allocation5 + $0x30] sm:$0xff]  ;;  %v58_v10 = vld [vmem:[#allocation5] sm:$0xff]  ;;  %s476_s1 = smov 1   ;;  %s477_s21 = smov 127  }
  0x1c   :  { %389 = vset.pattern.permute.xlu1 %v474_v2  ;;  %388 = vset.pattern.permute.xlu0 %v475_v3  ;;  %v521_v5 = vand.u32 127, %v46_v4  ;;  %v82_v11 = vld [vmem:[#allocation5 + $0x40] sm:$0xff]  ;;  %v83_v12 = vld [vmem:[#allocation5 + $0x48] sm:$0xff]  ;;  %v77_v15 = vld [vmem:[#allocation5 + $0x10] sm:$0xff]  ;;  %v66_v22 = vmul.f32 %v64_v8, %v515_v1  ;;  %v65_v23 = vmul.f32 %v63_v9, %v509_v0  ;;  %v478_v63 = vmov 0   ;;  %s486_s22 = smov [#allocation7]  }
  0x1d   :  { %v59_v14 = vld [vmem:[#allocation5 + $0x8] sm:$0xff]  ;;  %v101_v17 = vld [vmem:[#allocation5 + $0x50] sm:$0xff]  ;;  %v78_v18 = vld [vmem:[#allocation5 + $0x18] sm:$0xff]  ;;  %v85_v29 = vmul.f32 %v83_v12, %v515_v1  ;;  %v84_v30 = vmul.f32 %v82_v11, %v509_v0  ;;  %s360_s23 = sshll.u32 %s486_s22, 4  ;;  %s361_s23 = int_to_ptr.vmem [resolvable:$true] %s360_s23 }
  0x1e   :  { %vm48_vm0 = vcmp.lt.s32.totalorder %v521_v5, 16  ;;  %vm55_vm1 = vcmp.lt.s32.totalorder %v521_v5, 112  ;;  %v96_v19 = vld [vmem:[#allocation5 + $0x20] sm:$0xff]  ;;  %v102_v24 = vld [vmem:[#allocation5 + $0x58] sm:$0xff]  ;;  %v71_v26 = vld [vmem:[#allocation5 + $0x68] sm:$0xff]  ;;  %v103_v35 = vmul.f32 %v101_v17, %v509_v0  ;;  %vm118_vm2 = vcmp.lt.s32.totalorder %v521_v5, 1  ;;  %p448_p11 = scmp.lt.s32.totalorder %s361_s23, %s361_s23 }
  0x1f   :  { %53 = vrot.lane.b32.xlu1 %v515_v1, %s473_s0  ;;  %44 = vrot.lane.b32.xlu0 %v515_v1, %s472_s18  ;;  %v70_v25 = vld [vmem:[#allocation5 + $0x60] sm:$0xff]  ;;  %v89_v31 = vld [vmem:[#allocation5 + $0x70] sm:$0xff]  ;;  %v90_v32 = vld [vmem:[#allocation5 + $0x78] sm:$0xff]  ;;  %v104_v40 = vmul.f32 %v102_v24, %v515_v1  ;;  %vm127_vm3 = vcmp.lt.s32.totalorder %v521_v5, 127  ;;  %s443_s24 = scalar_lea.vmem %s361_s23, 256 }
  0x20   :  { %v97_v36 = vld [vmem:[#allocation5 + $0x28] sm:$0xff]  ;;  %v108_v45 = vld [vmem:[#allocation5 + $0x80] sm:$0xff]  ;;  %p444_p10 = scmp.ne.s32.totalorder %s361_s23, %s443_s24  ;;  %p449_p12 = scmp.lt.s32.totalorder %s443_s24, %s443_s24 }
  0x21   :  { %v109_v57 = vld [vmem:[#allocation5 + $0x88] sm:$0xff]  ;;  %v541_v58 = vld [vmem:[#allocation5 + $0x120] sm:$0xff] }
  0x22   :  { %p450_p13 = por %p449_p12, %p448_p11 }
  0x24   :  { %p451_p0 = pnand %p450_p13, %p444_p10 }
  0x8d   :  { %v52_v6 = vpop.permute.xlu1 %51  ;;  %v43_v7 = vpop.permute.xlu0 %42 }
  0x91   :  { %v54_v13 = vpop.permute.xlu1 %53  ;;  %v45_v16 = vpop.permute.xlu0 %44 }
  0x92   :  { %v49_v20 = vsel %vm48_vm0, %v43_v7, %v45_v16  ;;  %v50_v21 = vsel %vm48_vm0, %v45_v16, %v43_v7  ;;  %v56_v27 = vsel %vm55_vm1, %v52_v6, %v54_v13  ;;  %v57_v28 = vsel %vm55_vm1, %v54_v13, %v52_v6 }
  0x93   :  { %v60_v33 = vmul.f32 %v58_v10, %v50_v21  ;;  %v61_v34 = vmul.f32 %v59_v14, %v49_v20  ;;  %v79_v37 = vmul.f32 %v77_v15, %v50_v21  ;;  %v80_v38 = vmul.f32 %v78_v18, %v49_v20 }
  0x94   :  { %v98_v39 = vmul.f32 %v96_v19, %v50_v21  ;;  %v72_v41 = vmul.f32 %v70_v25, %v56_v27  ;;  %v73_v42 = vmul.f32 %v71_v26, %v57_v28  ;;  %v91_v46 = vmul.f32 %v89_v31, %v56_v27 }
  0x95   :  { %v68_v43 = vadd.f32 %v66_v22, %v61_v34  ;;  %v67_v44 = vadd.f32 %v65_v23, %v60_v33  ;;  %v92_v47 = vmul.f32 %v90_v32, %v57_v28  ;;  %v86_v48 = vadd.f32 %v84_v30, %v79_v37 }
  0x96   :  { %v87_v49 = vadd.f32 %v85_v29, %v80_v38  ;;  %v99_v50 = vmul.f32 %v97_v36, %v49_v20  ;;  %v105_v53 = vadd.f32 %v103_v35, %v98_v39  ;;  %v110_v56 = vmul.f32 %v108_v45, %v56_v27 }
  0x97   :  { %v75_v51 = vadd.f32 %v73_v42, %v68_v43  ;;  %v74_v52 = vadd.f32 %v72_v41, %v67_v44  ;;  %v93_v54 = vadd.f32 %v91_v46, %v86_v48  ;;  %v111_v61 = vmul.f32 %v109_v57, %v57_v28 }
  0x98   :  { %v94_v55 = vadd.f32 %v92_v47, %v87_v49  ;;  %v112_v59 = vadd.f32 %v110_v56, %v105_v53  ;;  %v106_v60 = vadd.f32 %v104_v40, %v99_v50  ;;  %v479_v44 = vmov 3  }
  0x99   :  { %116 = vrot.lane.b32.xlu1 %v75_v51, %s476_s1  ;;  %114 = vrot.lane.b32.xlu0 %v74_v52, %s476_s1  ;;  %v480_v45 = vmov 4  }
  0x9a   :  { %v113_v62 = vadd.f32 %v111_v61, %v106_v60 }
  0x9d   :  { %123 = vrot.lane.b32.xlu0 %v112_v59, %s477_s21  ;;  %142 = vperm.xlu1 %389, %v541_v58  }
  0xa1   :  { %125 = vrot.lane.b32.xlu1 %v113_v62, %s477_s21  ;;  %134 = vperm.xlu0 %388, %v541_v58  }
  0xa2   :  { %390 = vset.pattern.permute.xlu1 %v478_v63 }
  0xa5   :  { %152 = vperm.xlu1 %390, %v541_v58   ;;  %391 = vset.pattern.permute.xlu0 %v479_v44 }
  0xa9   :  { %392 = vset.pattern.permute.xlu1 %v480_v45 }
 0x10b   :  { %v117_v2 = vpop.permute.xlu1 %116  ;;  %v115_v3 = vpop.permute.xlu0 %114 }
 0x10c   :  { %v119_v6 = vsel %vm118_vm2, %v115_v3, %v117_v2  ;;  %v120_v7 = vsel %vm118_vm2, %v117_v2, %v115_v3 }
 0x10d   :  { %v121_v9 = vadd.f32 %v120_v7, %v93_v54  ;;  %v122_v10 = vadd.f32 %v119_v6, %v94_v55  ;;  %v482_v6 = vmov 6  }
 0x10f   :  { %v124_v8 = vpop.permute.xlu0 %123 }
 0x118   :  { %v143_v4 = vpop.permute.xlu1 %142 }
 0x11c   :  { %v126_v11 = vpop.permute.xlu1 %125  ;;  %v135_v16 = vpop.permute.xlu0 %134 }
 0x11d   :  { %v128_v12 = vsel %vm127_vm3, %v124_v8, %v126_v11  ;;  %v129_v13 = vsel %vm127_vm3, %v126_v11, %v124_v8  ;;  %v236_v8 = vld [vmem:[#allocation5 + $0xd0] sm:$0xff]  ;;  %v237_v11 = vld [vmem:[#allocation5 + $0xd8] sm:$0xff] }
 0x11e   :  { %v130_v14 = vadd.f32 %v128_v12, %v121_v9  ;;  %v131_v15 = vadd.f32 %v129_v13, %v122_v10  ;;  %v231_v9 = vld [vmem:[#allocation5 + $0xa0] sm:$0xff]  ;;  %v232_v10 = vld [vmem:[#allocation5 + $0xa8] sm:$0xff] }
 0x120   :  { %v139_v17 = vrot.slane %v130_v14, 1  ;;  %v140_v18 = vrot.slane %v131_v15, 1  ;;  %v149_v19 = vrot.slane %v130_v14, 7  ;;  %v150_v20 = vrot.slane %v131_v15, 7  ;;  %v153_v21 = vpop.permute.xlu1 %152 }
 0x121   :  { %v137_v24 = vmul.f32 %v135_v16, %v130_v14  ;;  %v138_v25 = vmul.f32 %v135_v16, %v131_v15 }
 0x122   :  { %v145_v22 = vmul.f32 %v143_v4, %v139_v17  ;;  %v146_v23 = vmul.f32 %v143_v4, %v140_v18  ;;  %v155_v28 = vmul.f32 %v153_v21, %v149_v19  ;;  %v156_v29 = vmul.f32 %v153_v21, %v150_v20  ;;  %v212_v19 = vld [vmem:[#allocation5 + $0x90] sm:$0xff] }
 0x123   :  { %v481_v4 = vmov 7   ;;  %v250_v20 = vld [vmem:[#allocation5 + $0xb0] sm:$0xff] }
 0x124   :  { %v147_v26 = vadd.f32 %v145_v22, %v137_v24  ;;  %v148_v27 = vadd.f32 %v146_v23, %v138_v25  ;;  %v217_v24 = vld [vmem:[#allocation5 + $0xc0] sm:$0xff]  ;;  %v213_v25 = vld [vmem:[#allocation5 + $0x98] sm:$0xff] }
 0x126   :  { %v157_v30 = vadd.f32 %v155_v28, %v147_v26  ;;  %v158_v31 = vadd.f32 %v156_v29, %v148_v27  ;;  %v255_v27 = vld [vmem:[#allocation5 + $0xe0] sm:$0xff]  ;;  %v224_v29 = vld [vmem:[#allocation5 + $0xf0] sm:$0xff] }
 0x128   :  { %v161_v32 = vrot.slane %v157_v30, 4  ;;  %v162_v33 = vrot.slane %v158_v31, 4  ;;  %v159_v34 = vmul.f32 %v157_v30, %v157_v30  ;;  %v160_v35 = vmul.f32 %v158_v31, %v158_v31 }
 0x12a   :  { %v163_v36 = vadd.f32 %v161_v32, %v157_v30  ;;  %v164_v37 = vadd.f32 %v162_v33, %v158_v31  ;;  %v165_v38 = vrot.slane %v159_v34, 4  ;;  %v166_v39 = vrot.slane %v160_v35, 4  ;;  %v262_v32 = vld [vmem:[#allocation5 + $0x110] sm:$0xff] }
 0x12c   :  { %v169_v40 = vadd.f32 %v164_v37, %v163_v36  ;;  %v167_v41 = vadd.f32 %v165_v38, %v159_v34  ;;  %v168_v42 = vadd.f32 %v166_v39, %v160_v35  ;;  %v218_v35 = vld [vmem:[#allocation5 + $0xc8] sm:$0xff]  ;;  %v225_v37 = vld [vmem:[#allocation5 + $0xf8] sm:$0xff] }
 0x12e   :  { %170 = vadd.xlane.f32.xlu0 %v169_v40  ;;  %v173_v43 = vadd.f32 %v168_v42, %v167_v41 }
 0x130   :  { %174 = vadd.xlane.f32.xlu1 %v173_v43 }
 0x141   :  { %192 = vperm.xlu1 %392, %v541_v58  }
 0x145   :  { %394 = vset.pattern.permute.xlu1 %v481_v4 }
 0x1b7   :  { %v171_v46 = vpop.xlane.xlu0 %170 }
 0x1b8   :  { %v172_v47 = vmul.f32 0.001953125, %v171_v46 }
 0x1b9   :  { %v175_v48 = vpop.xlane.xlu1 %174 }
 0x1ba   :  { %v177_v49 = vmul.f32 %v172_v47, %v172_v47  ;;  %v176_v50 = vmul.f32 0.001953125, %v175_v48  ;;  %v182_v55 = vsub.f32 %v157_v30, %v172_v47  ;;  %v183_v56 = vsub.f32 %v158_v31, %v172_v47  ;;  %v243_v30 = vld [vmem:[#allocation5 + $0x100] sm:$0xff]  ;;  %v244_v31 = vld [vmem:[#allocation5 + $0x108] sm:$0xff] }
 0x1bc   :  { %v178_v51 = vsub.f32 %v176_v50, %v177_v49 }
 0x1bd   :  { %v193_v59 = vpop.permute.xlu1 %192 }
 0x1be   :  { %v179_v52 = vadd.f32 1e-05, %v178_v51 }
 0x1c0   :  { %399 = vrsqrt.f32 %v179_v52 }
 0x1cd   :  { %v400_v53 = vpop.eup %399 }
 0x1ce   :  { %v181_v54 = vmul.f32 %v400_v53, %v541_v58 }
 0x1d0   :  { %186 = vperm.xlu0 %391, %v181_v54   ;;  %v251_v54 = vld [vmem:[#allocation5 + $0xb8] sm:$0xff] }
 0x1d4   :  { %393 = vset.pattern.permute.xlu0 %v482_v6 }
 0x24b   :  { %v187_v57 = vpop.permute.xlu0 %186 }
 0x24c   :  { %v189_v60 = vmul.f32 %v187_v57, %v182_v55  ;;  %v190_v61 = vmul.f32 %v187_v57, %v183_v56  ;;  %v263_v56 = vld [vmem:[#allocation5 + $0x118] sm:$0xff]  ;;  %v256_v57 = vld [vmem:[#allocation5 + $0xe8] sm:$0xff] }
 0x24e   :  { %v195_v62 = vadd.f32 %v193_v59, %v189_v60  ;;  %v196_v63 = vadd.f32 %v193_v59, %v190_v61 }
 0x250   :  { %v197_v2 = vmax.f32 %v195_v62, 0.0  ;;  %v561_v3 = vmax.f32 %v196_v63, 0.0 }
 0x252   :  { %199 = vrot.lane.b32.xlu1 %v197_v2, %s472_s18  ;;  %v239_v15 = vmul.f32 %v237_v11, %v561_v3  ;;  %v238_v18 = vmul.f32 %v236_v8, %v197_v2  ;;  %v219_v34 = vmul.f32 %v217_v24, %v197_v2  ;;  %v257_v40 = vmul.f32 %v255_v27, %v197_v2 }
 0x253   :  { %v220_v47 = vmul.f32 %v218_v35, %v561_v3  ;;  %v258_v61 = vmul.f32 %v256_v57, %v561_v3 }
 0x256   :  { %201 = vrot.lane.b32.xlu1 %v561_v3, %s472_s18 }
 0x25a   :  { %205 = vrot.lane.b32.xlu1 %v197_v2, %s473_s0  ;;  %v483_v2 = vmov 5  }
 0x25e   :  { %207 = vrot.lane.b32.xlu1 %v561_v3, %s473_s0 }
 0x2c4   :  { %v200_v7 = vpop.permute.xlu1 %199 }
 0x2c8   :  { %v202_v12 = vpop.permute.xlu1 %201 }
 0x2c9   :  { %v203_v13 = vsel %vm48_vm0, %v200_v7, %v202_v12  ;;  %v204_v14 = vsel %vm48_vm0, %v202_v12, %v200_v7 }
 0x2ca   :  { %v233_v16 = vmul.f32 %v231_v9, %v204_v14  ;;  %v234_v17 = vmul.f32 %v232_v10, %v203_v13  ;;  %v214_v26 = vmul.f32 %v212_v19, %v204_v14  ;;  %v252_v28 = vmul.f32 %v250_v20, %v204_v14 }
 0x2cb   :  { %v215_v36 = vmul.f32 %v213_v25, %v203_v13  ;;  %v253_v59 = vmul.f32 %v251_v54, %v203_v13 }
 0x2cc   :  { %v240_v21 = vadd.f32 %v238_v18, %v233_v16  ;;  %v241_v22 = vadd.f32 %v239_v15, %v234_v17  ;;  %v206_v23 = vpop.permute.xlu1 %205  ;;  %v221_v44 = vadd.f32 %v219_v34, %v214_v26  ;;  %v259_v46 = vadd.f32 %v257_v40, %v252_v28 }
 0x2cd   :  { %v222_v53 = vadd.f32 %v220_v47, %v215_v36  ;;  %v260_v62 = vadd.f32 %v258_v61, %v253_v59 }
 0x2d0   :  { %v208_v33 = vpop.permute.xlu1 %207 }
 0x2d1   :  { %v209_v38 = vsel %vm55_vm1, %v206_v23, %v208_v33  ;;  %v210_v39 = vsel %vm55_vm1, %v208_v33, %v206_v23 }
 0x2d2   :  { %v226_v41 = vmul.f32 %v224_v29, %v209_v38  ;;  %v245_v42 = vmul.f32 %v243_v30, %v209_v38  ;;  %v246_v43 = vmul.f32 %v244_v31, %v210_v39  ;;  %v264_v45 = vmul.f32 %v262_v32, %v209_v38 }
 0x2d3   :  { %v227_v48 = vmul.f32 %v225_v37, %v210_v39  ;;  %v265_v60 = vmul.f32 %v263_v56, %v210_v39 }
 0x2d4   :  { %v228_v49 = vadd.f32 %v226_v41, %v221_v44  ;;  %v247_v50 = vadd.f32 %v245_v42, %v240_v21  ;;  %v248_v51 = vadd.f32 %v246_v43, %v241_v22  ;;  %v266_v52 = vadd.f32 %v264_v45, %v259_v46 }
 0x2d5   :  { %v229_v55 = vadd.f32 %v227_v48, %v222_v53  ;;  %v267_v63 = vadd.f32 %v265_v60, %v260_v62  ;;  %v484_v44 = vmov 8   ;;  %v485_v45 = vmov 9  }
 0x2d6   :  { %268 = vrot.lane.b32.xlu1 %v228_v49, %s476_s1  ;;  %276 = vrot.lane.b32.xlu0 %v266_v52, %s477_s21 }
 0x2da   :  { %270 = vrot.lane.b32.xlu1 %v229_v55, %s476_s1  ;;  %285 = vperm.xlu0 %393, %v541_v58  }
 0x2de   :  { %293 = vperm.xlu1 %394, %v541_v58   ;;  %396 = vset.pattern.permute.xlu0 %v484_v44 }
 0x2e2   :  { %278 = vrot.lane.b32.xlu1 %v267_v63, %s477_s21 }
 0x2e3   :  { %395 = vset.pattern.permute.xlu1 %v483_v2 }
 0x2e6   :  { %303 = vperm.xlu1 %395, %v541_v58  }
 0x2ea   :  { %397 = vset.pattern.permute.xlu1 %v485_v45 }
 0x348   :  { %v269_v4 = vpop.permute.xlu1 %268  ;;  %v277_v3 = vpop.permute.xlu0 %276 }
 0x34c   :  { %v271_v6 = vpop.permute.xlu1 %270 }
 0x34d   :  { %v272_v8 = vsel %vm118_vm2, %v269_v4, %v271_v6  ;;  %v273_v9 = vsel %vm118_vm2, %v271_v6, %v269_v4 }
 0x34e   :  { %v274_v10 = vadd.f32 %v273_v9, %v247_v50  ;;  %v275_v11 = vadd.f32 %v272_v8, %v248_v51 }
 0x355   :  { %v286_v17 = vpop.permute.xlu0 %285 }
 0x359   :  { %v294_v7 = vpop.permute.xlu1 %293 }
 0x35d   :  { %v279_v12 = vpop.permute.xlu1 %278 }
 0x35e   :  { %v280_v13 = vsel %vm127_vm3, %v277_v3, %v279_v12  ;;  %v281_v14 = vsel %vm127_vm3, %v279_v12, %v277_v3 }
 0x35f   :  { %v282_v15 = vadd.f32 %v280_v13, %v274_v10  ;;  %v283_v16 = vadd.f32 %v281_v14, %v275_v11 }
 0x361   :  { %v290_v18 = vrot.slane %v282_v15, 1  ;;  %v291_v19 = vrot.slane %v283_v16, 1  ;;  %v300_v20 = vrot.slane %v282_v15, 7  ;;  %v301_v21 = vrot.slane %v283_v16, 7  ;;  %v304_v22 = vpop.permute.xlu1 %303 }
 0x362   :  { %v288_v23 = vmul.f32 %v286_v17, %v282_v15  ;;  %v289_v24 = vmul.f32 %v286_v17, %v283_v16 }
 0x363   :  { %v296_v25 = vmul.f32 %v294_v7, %v290_v18  ;;  %v297_v26 = vmul.f32 %v294_v7, %v291_v19  ;;  %v306_v29 = vmul.f32 %v304_v22, %v300_v20  ;;  %v307_v30 = vmul.f32 %v304_v22, %v301_v21 }
 0x365   :  { %v298_v27 = vadd.f32 %v296_v25, %v288_v23  ;;  %v299_v28 = vadd.f32 %v297_v26, %v289_v24 }
 0x367   :  { %v308_v31 = vadd.f32 %v306_v29, %v298_v27  ;;  %v309_v32 = vadd.f32 %v307_v30, %v299_v28 }
 0x369   :  { %v312_v5 = vrot.slane %v308_v31, 4  ;;  %v313_v33 = vrot.slane %v309_v32, 4  ;;  %v310_v34 = vmul.f32 %v308_v31, %v308_v31  ;;  %v311_v35 = vmul.f32 %v309_v32, %v309_v32 }
 0x36b   :  { %v314_v36 = vadd.f32 %v312_v5, %v308_v31  ;;  %v315_v37 = vadd.f32 %v313_v33, %v309_v32  ;;  %v316_v38 = vrot.slane %v310_v34, 4  ;;  %v317_v39 = vrot.slane %v311_v35, 4 }
 0x36d   :  { %v320_v40 = vadd.f32 %v315_v37, %v314_v36  ;;  %v318_v41 = vadd.f32 %v316_v38, %v310_v34  ;;  %v319_v42 = vadd.f32 %v317_v39, %v311_v35 }
 0x36f   :  { %321 = vadd.xlane.f32.xlu0 %v320_v40  ;;  %v324_v43 = vadd.f32 %v319_v42, %v318_v41 }
 0x371   :  { %325 = vadd.xlane.f32.xlu1 %v324_v43 }
 0x382   :  { %343 = vperm.xlu1 %397, %v541_v58  }
 0x3f8   :  { %v322_v46 = vpop.xlane.xlu0 %321 }
 0x3f9   :  { %v323_v47 = vmul.f32 0.001953125, %v322_v46 }
 0x3fa   :  { %v326_v48 = vpop.xlane.xlu1 %325 }
 0x3fb   :  { %v328_v49 = vmul.f32 %v323_v47, %v323_v47  ;;  %v327_v50 = vmul.f32 0.001953125, %v326_v48  ;;  %v333_v55 = vsub.f32 %v308_v31, %v323_v47  ;;  %v334_v56 = vsub.f32 %v309_v32, %v323_v47 }
 0x3fd   :  { %v329_v51 = vsub.f32 %v327_v50, %v328_v49 }
 0x3fe   :  { %v344_v59 = vpop.permute.xlu1 %343 }
 0x3ff   :  { %v330_v52 = vadd.f32 1e-05, %v329_v51 }
 0x401   :  { %401 = vrsqrt.f32 %v330_v52 }
 0x40e   :  { %v402_v53 = vpop.eup %401 }
 0x40f   :  { %v332_v54 = vmul.f32 %v402_v53, %v541_v58 }
 0x411   :  { %337 = vperm.xlu0 %396, %v332_v54  }
 0x415   :  { %398 = vset.pattern.permute.xlu0 %v485_v45 }
 0x48c   :  { %v338_v57 = vpop.permute.xlu0 %337 }
 0x48d   :  { %v340_v60 = vmul.f32 %v338_v57, %v333_v55  ;;  %v341_v61 = vmul.f32 %v338_v57, %v334_v56 }
 0x48f   :  { %v346_v62 = vadd.f32 %v344_v59, %v340_v60  ;;  %v347_v63 = vadd.f32 %v344_v59, %v341_v61 }
 0x491   :  { %v348_v2 = vmax.f32 %v346_v62, 0.0  ;;  %v349_v4 = vmax.f32 %v347_v63, 0.0 }
 0x493   :  { %v350_v6 = vadd.f32 %v348_v2, %v509_v0  ;;  %v351_v7 = vadd.f32 %v349_v4, %v515_v1 }
 0x495   :  { %352 = vst [vmem:[#allocation7] sm:$0xff] %v350_v6  ;;  %353 = vst [vmem:[#allocation7 + $0x8] sm:$0xff] %v351_v7 }
 0x496   :  { %454 = shalt.err (!%p451_p0)
}
 0x497   :  { %363 = dma.vmem_to_hbm [thread:$0]  %s361_s23, 256, %s603_s2, [#allocation4]  }
 0x498   :  { %467 = dma.done.wait [#allocation4], 256  }
 0x499   :  { %468 = vsyncadd [#allocation4], 4294967040 }
 0x49a   :  { %367 = vsyncpa [#allocation3], 1 }
 0x49b   :  { %368 = vsyncpa [#allocation6], 1 }
 0x49c   :  { %369 = vsyncpa [#allocation4], 1 }

</bundles_post_ra>
